<compile_context>
chip_gen: v7x
topology: tpu7x:2x2x1
jax: 0.10.0
libtpu: 0.0.40
codegen_flags: <defaults>
</compile_context>

<pallas_src>
import functools
import math

import jax
import jax.numpy as jnp
from jax.experimental import pallas as pl
from jax.experimental.pallas import tpu as pltpu

_LOG_2PI = math.log(2.0 * math.pi)


def _cdiv(a, b):
    return -(-a // b)


def _round_up(a, b):
    return _cdiv(a, b) * b


# --------------------------------------------------------------------------- #
# log_probs hot-path kernel.  Tiles are (TB, fn) with fn == 128 whenever the   #
# fold path fires.  Only VPU sub/mul + one MXU matmul (segmented row sums) and #
# one dense store per tile; no exp, no reciprocal, no (B, N) outputs.          #
# --------------------------------------------------------------------------- #
def _log_probs_kernel(x_ref, a_ref, inv_ref, *rest, fold):
    out_ref = rest[-1]
    x = x_ref[...].astype(jnp.float32)                   # (TB, fn)
    a = a_ref[...].astype(jnp.float32)
    z = (a - x) * inv_ref[...]                           # (1, fn) row broadcast
    z2 = z * z
    if fold > 1:
        # Segmented per-logical-row reduction on the (otherwise idle) MXU:
        # (TB, fn) @ (fn, fold) block-diagonal 0/1 selector -> (TB, fold).
        sel_ref = rest[0]
        out_ref[...] = -0.5 * jnp.dot(z2, sel_ref[...],
                                      preferred_element_type=jnp.float32)
    else:
        out_ref[...] = -0.5 * jnp.sum(z2, axis=-1, keepdims=True)


def _fixed_normal_log_probs(mean, actions, inv_std_row, logp_const,
                            *, vmem_input_budget_bytes=16 << 20,
                            max_block_rows=4096):
    b, n = mean.shape
    orig_b = b

    # ---- lane-density fold: pad N up to a power-of-two divisor of 128 and
    # pack fold = 128 // n_pad logical rows into one 128-lane physical row.
    if n < 128:
        n_pad = 1
        while n_pad < n:
            n_pad *= 2
        fold = 128 // n_pad
    else:
        n_pad = n
        fold = 1

    x, a = mean, actions
    inv = inv_std_row.reshape(1, n).astype(jnp.float32)

    if n_pad != n:
        # Zero inv_std in the pad lanes -> padded lanes contribute exactly 0.
        x = jnp.pad(x, ((0, 0), (0, n_pad - n)))
        a = jnp.pad(a, ((0, 0), (0, n_pad - n)))
        inv = jnp.pad(inv, ((0, 0), (0, n_pad - n)))

    if fold > 1 and b % fold != 0:
        pad_b = _round_up(b, fold) - b
        x = jnp.pad(x, ((0, pad_b), (0, 0)))
        a = jnp.pad(a, ((0, pad_b), (0, 0)))
        b += pad_b

    bf = b // fold
    fn = fold * n_pad                      # == 128 whenever fold > 1

    xf = x.reshape(bf, fn)
    af = a.reshape(bf, fn)
    inv_f = jnp.tile(inv, (1, fold))       # (1, fn)

    # ---- row-tile size derived from a VMEM byte budget (2 f32 inputs,
    # double-buffered), capped at max_block_rows.
    bytes_per_row = 2 * 2 * fn * 4
    tb = max(8, (vmem_input_budget_bytes // bytes_per_row) // 8 * 8)
    tb = min(tb, max_block_rows)
    # Keep >= 2 (ideally >= 4) grid steps when the batch is large enough so the
    # "parallel" grid axis can feed both v7x TensorCores.
    if bf >= 4 * 512:
        tb = min(tb, max(512, _round_up(_cdiv(bf, 4), 8)))
    elif bf >= 16:
        tb = min(tb, max(8, _round_up(_cdiv(bf, 2), 8)))
    if tb >= bf:
        tb = bf                            # single step: full-extent block
    grid = (_cdiv(bf, tb),)

    in_arrays = [xf, af, inv_f]
    in_specs = [
        pl.BlockSpec((tb, fn), lambda i: (i, 0)),        # x tile
        pl.BlockSpec((tb, fn), lambda i: (i, 0)),        # actions tile
        pl.BlockSpec((1, fn), lambda i: (0, 0)),         # inv_std row (constant)
    ]
    if fold > 1:
        # Constant block-diagonal selector: sel[j, f] = 1 iff lane j belongs to
        # logical-row segment f.
        seg = jnp.arange(fn, dtype=jnp.int32) // n_pad
        sel = (seg[:, None] == jnp.arange(fold, dtype=jnp.int32)[None, :]
               ).astype(jnp.float32)                     # (fn, fold)
        in_arrays.append(sel)
        in_specs.append(pl.BlockSpec((fn, fold), lambda i: (0, 0)))

    # VMEM sizing from actual tile footprint (lane dims pad to >= 128),
    # 2x headroom; stays under v7x's 64 MiB physical VMEM.
    est = (2 * 2 * tb * fn * 4                           # x + actions tiles
           + 2 * tb * max(fold, 128) * 4                 # output tiles
           + 2 * 8 * fn * 4)                             # inv_std row
    if fold > 1:
        est += 2 * fn * 128 * 4                          # selector (fn == 128)
    vmem_limit = int(min(max(2 * est, 8 << 20), 40 << 20))

    kernel = functools.partial(_log_probs_kernel, fold=fold)
    out = pl.pallas_call(
        kernel,
        out_shape=jax.ShapeDtypeStruct((bf, fold), jnp.float32),
        grid=grid,
        in_specs=in_specs,
        out_specs=pl.BlockSpec((tb, fold), lambda i: (i, 0)),
        compiler_params=pltpu.CompilerParams(
            dimension_semantics=("parallel",),           # batch axis: megacore
            vmem_limit_bytes=vmem_limit,
        ),
    )(*in_arrays)

    # Unfold, strip batch padding, add the batch-invariant additive constant.
    return out.reshape(b, 1)[:orig_b] + logp_const


# --------------------------------------------------------------------------- #
# PyTorch-compatible API                                                       #
# --------------------------------------------------------------------------- #
class FixedNormal:
    """Diagonal Normal whose std / entropy are batch-invariant row constants."""

    def __init__(self, mean, logstd_row):
        self.mean = mean                                  # (B, N): identity alias of x
        self._logstd_row = logstd_row                     # (1, N) f32
        # Batch-invariant row stats: plain jnp (tiny, fuses with neighbors).
        self.std_row = jnp.exp(logstd_row)                # (1, N)
        self._ent_row = 0.5 + 0.5 * _LOG_2PI + logstd_row  # (1, N)
        self._inv_std_row = jnp.exp(-logstd_row)          # (1, N)
        n = logstd_row.shape[-1]
        self._logp_const = -jnp.sum(logstd_row) - 0.5 * n * _LOG_2PI  # scalar

    @property
    def stddev(self):
        # PyTorch-shape-compatible (B, N) view; lazy broadcast, no kernel writes.
        return jnp.broadcast_to(self.std_row, self.mean.shape)

    def mode(self):
        return self.mean

    def entropy(self):
        return jnp.broadcast_to(self._ent_row, self.mean.shape)

    def log_probs(self, actions):
        return _fixed_normal_log_probs(self.mean, actions,
                                       self._inv_std_row, self._logp_const)

    # TODO(synk): FixedNormal.sample / rsample (RNG draw) not implemented; not
    # part of DiagGaussian.forward.


def diag_gaussian_forward(x, logstd_param):
    """DiagGaussian.forward: FixedNormal(mean=x, std=exp(logstd) broadcast)."""
    n = x.shape[-1]
    logstd_row = logstd_param.reshape(1, n).astype(jnp.float32)  # bias.t().view(1,-1)
    return FixedNormal(x, logstd_row)


# --------------------------------------------------------------------------- #
# Demo / self-test                                                             #
# --------------------------------------------------------------------------- #
if __name__ == "__main__":
    def _reference(x, actions, logstd_row):
        std = jnp.exp(logstd_row)
        z = (actions - x) / std
        lp = jnp.sum(-0.5 * z * z - logstd_row - 0.5 * _LOG_2PI,
                     axis=-1, keepdims=True)
        ent = jnp.broadcast_to(0.5 + 0.5 * _LOG_2PI + logstd_row, x.shape)
        return jnp.broadcast_to(std, x.shape), ent, lp

    key = jax.random.PRNGKey(0)
    # Cases: power-of-two N (pure fold), non-power-of-two N + batch padding,
    # and a multi-step grid with a partial last tile.
    for (B, N) in [(8, 32), (10, 6), (1000, 6)]:
        key, kx, ka, kl = jax.random.split(key, 4)
        x = jax.random.normal(kx, (B, N), dtype=jnp.float32)
        actions = jax.random.normal(ka, (B, N), dtype=jnp.float32)
        # Module init is zeros(num_outputs).unsqueeze(1); use a non-zero
        # "trained" value so the exp / log-prob math is actually exercised.
        logstd_param = 0.1 * jax.random.normal(kl, (N, 1), dtype=jnp.float32)

        dist = diag_gaussian_forward(x, logstd_param)
        mean = dist.mean
        std = dist.stddev
        ent = dist.entropy()
        logp = dist.log_probs(actions)
        jax.block_until_ready((mean, std, ent, logp))

        ref_std, ref_ent, ref_lp = _reference(x, actions,
                                              logstd_param.reshape(1, N))

        assert mean.shape == (B, N) and std.shape == (B, N)
        assert ent.shape == (B, N) and logp.shape == (B, 1)
        assert jnp.allclose(mean, x)                        # identity, no copy
        assert jnp.allclose(std, ref_std, atol=1e-6)
        assert jnp.allclose(ent, ref_ent, atol=1e-6)
        assert jnp.allclose(logp, ref_lp, atol=1e-4, rtol=1e-5)

    print("KERNEL_OK")
</pallas_src>

<mosaic_0001>
module attributes {stable_mosaic.version = 11 : i64} {
  func.func @_log_probs_kernel(%arg0: i32, %arg1: memref<2x128xf32, #tpu.memory_space<vmem>>, %arg2: memref<2x128xf32, #tpu.memory_space<vmem>>, %arg3: memref<1x128xf32, #tpu.memory_space<vmem>>, %arg4: memref<128x4xf32, #tpu.memory_space<vmem>>, %arg5: memref<2x4xf32, #tpu.memory_space<vmem>>) attributes {dimension_semantics = [#tpu.dimension_semantics<parallel>], iteration_bounds = array<i64: 1>, scalar_prefetch = 0 : i64, scratch_operands = 0 : i64, tpu.core_type = #tpu.core_type<tc>, window_params = [{transform_indices = @transform_0, window_bounds = array<i64: 2, 128>}, {transform_indices = @transform_1, window_bounds = array<i64: 2, 128>}, {pipeline_mode = #tpu.pipeline_mode<synchronous>, transform_indices = @transform_2, window_bounds = array<i64: 1, 128>}, {pipeline_mode = #tpu.pipeline_mode<synchronous>, transform_indices = @transform_3, window_bounds = array<i64: 128, 4>}, {transform_indices = @transform_4, window_bounds = array<i64: 2, 4>}]} {
    %c0 = arith.constant 0 : index
    %c0_0 = arith.constant 0 : index
    %0 = vector.load %arg1[%c0, %c0_0] : memref<2x128xf32, #tpu.memory_space<vmem>>, vector<2x128xf32>
    %c0_1 = arith.constant 0 : index
    %c0_2 = arith.constant 0 : index
    %1 = vector.load %arg2[%c0_1, %c0_2] : memref<2x128xf32, #tpu.memory_space<vmem>>, vector<2x128xf32>
    %2 = arith.subf %1, %0 : vector<2x128xf32>
    %c0_3 = arith.constant 0 : index
    %c0_4 = arith.constant 0 : index
    %3 = vector.load %arg3[%c0_3, %c0_4] : memref<1x128xf32, #tpu.memory_space<vmem>>, vector<1x128xf32>
    %4 = vector.broadcast %3 : vector<1x128xf32> to vector<2x128xf32>
    %5 = arith.mulf %2, %4 : vector<2x128xf32>
    %6 = arith.mulf %5, %5 : vector<2x128xf32>
    %c0_5 = arith.constant 0 : index
    %c0_6 = arith.constant 0 : index
    %7 = vector.load %arg4[%c0_5, %c0_6] : memref<128x4xf32, #tpu.memory_space<vmem>>, vector<128x4xf32>
    %cst = arith.constant dense<0.000000e+00> : vector<2x4xf32>
    %8 = tpu.matmul %6, %7, %cst {dimension_numbers = #tpu.dot_dimension_numbers<[1], [0], [0], [1], [0, 0, 1, 1], [], []>} : vector<2x128xf32>, vector<128x4xf32>, vector<2x4xf32> -> vector<2x4xf32>
    %cst_7 = arith.constant -5.000000e-01 : f32
    %9 = vector.broadcast %cst_7 : f32 to vector<2x4xf32>
    %10 = arith.mulf %9, %8 : vector<2x4xf32>
    %c0_8 = arith.constant 0 : index
    %c0_9 = arith.constant 0 : index
    %11 = vector.load %arg5[%c0_8, %c0_9] : memref<2x4xf32, #tpu.memory_space<vmem>>, vector<2x4xf32>
    tpu.vector_store %arg5[%c0_8, %c0_9], %10 {strides = array<i32>} : memref<2x4xf32, #tpu.memory_space<vmem>>, vector<2x4xf32>,
    return
  }
  func.func @transform_0(%arg0: i32) -> (i32, i32) {
    %c0_i32 = arith.constant 0 : i32
    %c0_i32_0 = arith.constant 0 : i32
    return %arg0, %c0_i32 : i32, i32
  }
  func.func @transform_1(%arg0: i32) -> (i32, i32) {
    %c0_i32 = arith.constant 0 : i32
    %c0_i32_0 = arith.constant 0 : i32
    return %arg0, %c0_i32 : i32, i32
  }
  func.func @transform_2(%arg0: i32) -> (i32, i32) {
    %c0_i32 = arith.constant 0 : i32
    %c0_i32_0 = arith.constant 0 : i32
    %c0_i32_1 = arith.constant 0 : i32
    return %c0_i32, %c0_i32_0 : i32, i32
  }
  func.func @transform_3(%arg0: i32) -> (i32, i32) {
    %c0_i32 = arith.constant 0 : i32
    %c0_i32_0 = arith.constant 0 : i32
    %c0_i32_1 = arith.constant 0 : i32
    return %c0_i32, %c0_i32_0 : i32, i32
  }
  func.func @transform_4(%arg0: i32) -> (i32, i32) {
    %c0_i32 = arith.constant 0 : i32
    %c0_i32_0 = arith.constant 0 : i32
    return %arg0, %c0_i32 : i32, i32
  }
}

</mosaic_0001>

<bundles_post_ra>
// kernel: tpu_custom_call.1
= control target key start
LH: loop header
LB: loop body
LE: loop exit
PB: predicated region body
PF: predicated region fallthrough
CT: control target
= control target key end

     0   :  { %v238_v3 = vmov 0.0|0.0   ;;  %vm239_vm0 = vmmov 0   ;;  %v240_v6 = vmov 0.0   ;;  %s336_s0 = inlined_call_operand.vmem [shape: f32[2,128], index: 0, kind: input, shape index: {}]   ;;  %s337_s1 = inlined_call_operand.vmem [shape: f32[2,128], index: 1, kind: input, shape index: {}]   ;;  %s338_s2 = inlined_call_operand.vmem [shape: f32[1,128], index: 2, kind: input, shape index: {}]   ;;  %s339_s3 = inlined_call_operand.vmem [shape: f32[128,4], index: 3, kind: input, shape index: {}]   ;;  %s340_s4 = inlined_call_operand.hbm [shape: f32[2,4], index: 4, kind: output, shape index: {}]  }
   0x1   :  { %v30_v0 = vld [vmem:[%s339_s3] sm:$0xff]  ;;  %v31_v1 = vld [vmem:[%s339_s3 + $0x8] sm:$0xff]  ;;  %v32_v2 = vld [vmem:[%s339_s3 + $0x10] sm:$0xff]  ;;  %186 = vmatprep.subr.bf16.mxu0 %v238_v3  ;;  %183 = vmatprep.mubr.msk.f32.mxu0 %vm239_vm0, %v240_v6 }
   0x2   :  { %v187_v4 = vpack.c.bf16 %v31_v1, %v30_v0  ;;  %v33_v5 = vld [vmem:[%s339_s3 + $0x18] sm:$0xff]  ;;  %v34_v8 = vld [vmem:[%s339_s3 + $0x20] sm:$0xff]  ;;  %v35_v9 = vld [vmem:[%s339_s3 + $0x28] sm:$0xff] }
   0x3   :  { %v190_v7 = vpack.c.bf16 %v33_v5, %v32_v2 }
   0x4   :  { %188 = vmatpush3.bf16.msra.mxu0 %v187_v4 }
   0x5   :  { %189 = vmatprep.subr.bf16.mxu0 %v238_v3 }
   0x6   :  { %9 = vsyncpa [#allocation3], 0  ;;  %v193_v10 = vpack.c.bf16 %v35_v9, %v34_v8  ;;  %v36_v11 = vld [vmem:[%s339_s3 + $0x30] sm:$0xff]  ;;  %v37_v12 = vld [vmem:[%s339_s3 + $0x38] sm:$0xff]  ;;  %s241_s25 = smov [#allocation2]   ;;  %vm117_vm1 = vcmask 25600  }
   0x7   :  { %v196_v13 = vpack.c.bf16 %v37_v12, %v36_v11  ;;  %v38_v14 = vld [vmem:[%s339_s3 + $0x40] sm:$0xff]  ;;  %v39_v15 = vld [vmem:[%s339_s3 + $0x48] sm:$0xff]  ;;  %v40_v17 = vld [vmem:[%s339_s3 + $0x50] sm:$0xff]  ;;  %s125_s26 = sshll.u32 %s241_s25, 4  ;;  %s126_s26 = int_to_ptr.vmem [resolvable:$true] %s125_s26 }
   0x8   :  { %191 = vmatpush3.bf16.msra.mxu0 %v190_v7  ;;  %v199_v16 = vpack.c.bf16 %v39_v15, %v38_v14  ;;  %v41_v18 = vld [vmem:[%s339_s3 + $0x58] sm:$0xff]  ;;  %v18_v20 = vld [vmem:[%s336_s0] sm:$0x3]  ;;  %v43_v23 = vld [vmem:[%s339_s3 + $0x68] sm:$0xff]  ;;  %p219_p1 = scmp.lt.s32.totalorder %s126_s26, %s126_s26 }
   0x9   :  { %192 = vmatprep.subr.bf16.mxu0 %v238_v3  ;;  %v202_v19 = vpack.c.bf16 %v41_v18, %v40_v17  ;;  %v19_v21 = vld [vmem:[%s337_s1] sm:$0x3]  ;;  %v44_v27 = vld [vmem:[%s339_s3 + $0x70] sm:$0xff]  ;;  %v45_v28 = vld [vmem:[%s339_s3 + $0x78] sm:$0xff] }
   0xa   :  { %v42_v22 = vld [vmem:[%s339_s3 + $0x60] sm:$0xff]  ;;  %v20_v24 = vsub.f32 %v19_v21, %v18_v20  ;;  %v208_v30 = vpack.c.bf16 %v45_v28, %v44_v27 }
   0xb   :  { %v205_v25 = vpack.c.bf16 %v43_v23, %v42_v22  ;;  %v133_v26 = vld [vmem:[%s338_s2] ss:$0 sm:$0xff]  ;;  %s214_s2 = scalar_lea.vmem %s126_s26, 32 }
   0xc   :  { %194 = vmatpush3.bf16.msra.mxu0 %v193_v10  ;;  %v28_v29 = vmul.f32 %v133_v26, %v20_v24  ;;  %p215_p0 = scmp.ne.s32.totalorder %s126_s26, %s214_s2  ;;  %p220_p2 = scmp.lt.s32.totalorder %s214_s2, %s214_s2 }
   0xd   :  { %195 = vmatprep.subr.bf16.mxu0 %v238_v3 }
   0xe   :  { %v29_v31 = vmul.f32 %v28_v29, %v28_v29  ;;  %p221_p3 = por %p220_p2, %p219_p1 }
  0x10   :  { %197 = vmatpush3.bf16.msra.mxu0 %v196_v13  ;;  %p222_p4 = pnand %p221_p3, %p215_p0 }
  0x11   :  { %198 = vmatprep.subr.bf16.mxu0 %v238_v3 }
  0x14   :  { %200 = vmatpush3.bf16.msra.mxu0 %v199_v16 }
  0x15   :  { %201 = vmatprep.subr.bf16.mxu0 %v238_v3 }
  0x18   :  { %203 = vmatpush3.bf16.msra.mxu0 %v202_v19 }
  0x19   :  { %204 = vmatprep.subr.bf16.mxu0 %v238_v3 }
  0x1c   :  { %206 = vmatpush3.bf16.msra.mxu0 %v205_v25 }
  0x1d   :  { %207 = vmatprep.subr.bf16.mxu0 %v238_v3 }
  0x20   :  { %209 = vmatpush3.bf16.msra.mxu0 %v208_v30 }
  0x23   :  { %184 = vmatmul.mubr.f32.vlgmr.msra.gmra.mrb[0].mxu0 %v29_v31 }
  0xf6   :  { %v112_v32 = vpop.f32.mrb[0].mxu0 }
  0xf7   :  { %v116_v33 = vmul.f32 -0.5, %v112_v32  ;;  %v185_v34 = vpop.f32.mrb[1].mxu0 }
  0xf9   :  { %118 = vst.msk [vmem:[#allocation2] sm:$0x3] %vm117_vm1, %v116_v33 }
  0xfa   :  { %225 = shalt.err (!%p222_p4)
}
  0xfb   :  { %s226_s28 = scalar_lea.hbm %s340_s4, 32 }
  0xfc   :  { %p227_p5 = scmp.ne.s32.totalorder %s340_s4, %s226_s28  ;;  %p230_p6 = scmp.lt.u32.totalorder %s226_s28, %s340_s4 }
  0xfe   :  { %p232_p7 = pnand %p230_p6, %p227_p5 }
 0x100   :  { %235 = shalt.err (!%p232_p7)
}
 0x101   :  { %128 = dma.vmem_to_hbm [thread:$0]  %s126_s26, 32, %s340_s4, [#allocation3]  }
 0x102   :  { %236 = dma.done.wait [#allocation3], 32  }
 0x103   :  { %237 = vsyncadd [#allocation3], 4294967264 }
 0x104   :  { %132 = vsyncpa [#allocation3], 1 }

</bundles_post_ra>
